<compile_context>
chip_gen: v6e
topology: v6e:2x2x1
jax: 0.10.0
libtpu: 0.0.40
codegen_flags: <defaults>
</compile_context>

<pallas_src>
import numpy as np
import jax
import jax.numpy as jnp
from jax.experimental import pallas as pl
from jax.experimental.pallas import tpu as pltpu


# ----------------------------- fused Pallas kernel -----------------------------

def _make_shuffle_unit_kernel(H, W, NB, C):
    Cb = C // 2
    HW = H * W
    L = NB * HW  # lane extent inside the kernel

    def kernel(x_ref, wa_ref, w2p_ref, cp_ref, m_ref, o_ref):
        # ---- gather the NB images of this grid step side by side on the lane
        # axis -> (C, NB*H*W). HW is a multiple of 128, so this is pure vreg
        # placement (no relayout, no host-side transpose).
        if NB == 1:
            x = x_ref[0]
        else:
            x = jnp.concatenate([x_ref[b] for b in range(NB)], axis=1)

        cp = cp_ref[...]                      # (C, 16) packed per-channel columns
        taps = cp[:Cb, 0:9]                   # dw 3x3 taps (BN scale pre-folded)
        b1 = cp[:Cb, 9:10]                    # conv1 folded BN shift
        bdw = cp[:Cb, 10:11]                  # dw folded BN shift
        b2 = cp[:, 11:12]                     # conv2 folded BN shift (odd rows only)

        # ---- merged MXU matmul: rows [0:Cb]  = (s1-folded) 1x1 conv on x2
        #                         rows [Cb: ]  = 0/1 shuffle permutation of x1
        # bf16 operands, f32 accumulation.
        za = jnp.dot(wa_ref[...], x.astype(jnp.bfloat16),
                     preferred_element_type=jnp.float32)        # (Cb + C, L)
        h = jnp.maximum(za[:Cb] + b1, 0.0)    # branch2[0]: 1x1 + BN + ReLU
        ident = za[Cb:]                       # x1 routed to EVEN output channels

        # ---- branch2[1]: depthwise 3x3, stride 1, zero-pad 1, + folded BN.
        # Separable roll form: 2 column rolls (+masks) then 2 row rolls (+masks).
        m = m_ref[...]                        # (4, L) precomputed boundary masks
        mL, mR, mT, mB = m[0:1], m[1:2], m[2:3], m[3:4]
        hL = pltpu.roll(h, 1, 1) * mL         # value at col-1 (zeroed at col 0)
        hR = pltpu.roll(h, L - 1, 1) * mR     # value at col+1 (zeroed at col W-1)

        def row_comb(r):                      # r = dh + 1
            return (hL * taps[:, 3 * r:3 * r + 1]
                    + h * taps[:, 3 * r + 1:3 * r + 2]
                    + hR * taps[:, 3 * r + 2:3 * r + 3])

        h2 = row_comb(1) + bdw                               # dh = 0
        h2 = h2 + pltpu.roll(row_comb(0), W, 1) * mT         # dh = -1 (row above)
        h2 = h2 + pltpu.roll(row_comb(2), L - W, 1) * mB     # dh = +1 (row below)

        # ---- branch2[2]: 1x1 conv (s2 folded) + BN shift + ReLU, routed to the
        # ODD output channels (even rows of w2p/b2 are exactly zero -> relu(0)=0,
        # so the identity channels are untouched).
        z2 = jnp.dot(w2p_ref[...], h2.astype(jnp.bfloat16),
                     preferred_element_type=jnp.float32)      # (C, L)
        out = ident + jnp.maximum(z2 + b2, 0.0)

        # lane-aligned split back into the NB images (lane-dense stores).
        for b in range(NB):
            o_ref[b] = out[:, b * HW:(b + 1) * HW].astype(o_ref.dtype)

    return kernel


def _make_masks(H, W, NB):
    """Boundary masks for the roll-based zero-padded 3x3 depthwise, (4, NB*H*W)."""
    lane = np.arange(H * W)
    row, col = lane // W, lane % W
    masks = np.stack([(col >= 1), (col <= W - 2),
                      (row >= 1), (row <= H - 2)]).astype(np.float32)
    return np.tile(masks, (1, NB))


def _pick_batch_block(N):
    """Images per grid step: 1 on 2-TensorCore chips (v7x), N on single-TC chips."""
    try:
        kind = jax.devices()[0].device_kind.lower()
    except Exception:
        kind = ""
    if ("v7" in kind or "7x" in kind) and N >= 2:
        return 1
    return N


def shuffle_unit_forward(x_nchw, kp, *, nb):
    """ShuffleUnit forward, stride=1. x_nchw: (N, C, H, W). Returns (N, C, H, W)."""
    N, C, H, W = x_nchw.shape
    HW = H * W
    assert C % 2 == 0 and N % nb == 0
    x = x_nchw.reshape(N, C, HW)                       # metadata-only reshape
    masks = jnp.asarray(_make_masks(H, W, nb))         # compile-time constant
    kernel = _make_shuffle_unit_kernel(H, W, nb, C)

    const2d = lambda g: (0, 0)
    out = pl.pallas_call(
        kernel,
        out_shape=jax.ShapeDtypeStruct((N, C, HW), x_nchw.dtype),
        grid=(N // nb,),
        in_specs=[
            pl.BlockSpec((nb, C, HW), lambda g: (g, 0, 0)),
            pl.BlockSpec(kp["wa"].shape, const2d),
            pl.BlockSpec(kp["w2p"].shape, const2d),
            pl.BlockSpec(kp["colpack"].shape, const2d),
            pl.BlockSpec(masks.shape, const2d),
        ],
        out_specs=pl.BlockSpec((nb, C, HW), lambda g: (g, 0, 0)),
        compiler_params=pltpu.CompilerParams(
            dimension_semantics=("parallel",)),
    )(x, kp["wa"], kp["w2p"], kp["colpack"], masks)
    return out.reshape(N, C, H, W)


# ----------------------------- parameters -----------------------------

def init_raw_params(key, channels):
    """Raw PyTorch-style params (conv weights + eval-mode BN folded to s,b)."""
    Cb = channels // 2
    ks = iter(jax.random.split(key, 16))

    def conv_w(cout, cin):
        return jax.random.normal(next(ks), (cout, cin), jnp.float32) / np.sqrt(cin)

    def bn(c):
        gamma = 1.0 + 0.1 * jax.random.normal(next(ks), (c,), jnp.float32)
        beta = 0.1 * jax.random.normal(next(ks), (c,), jnp.float32)
        mean = 0.1 * jax.random.normal(next(ks), (c,), jnp.float32)
        var = jax.random.uniform(next(ks), (c,), jnp.float32, minval=0.5, maxval=1.5)
        s = gamma * jax.lax.rsqrt(var + 1e-5)
        return s, beta - mean * s

    w1 = conv_w(Cb, Cb); s1, b1 = bn(Cb)
    wdw = jax.random.normal(next(ks), (Cb, 3, 3), jnp.float32) / 3.0
    sdw, bdw = bn(Cb)
    w2 = conv_w(Cb, Cb); s2, b2 = bn(Cb)
    return dict(w1=w1, s1=s1, b1=b1, wdw=wdw, sdw=sdw, bdw=bdw,
                w2=w2, s2=s2, b2=b2)


def fold_params(raw, C):
    """Fold channel-split, BN scales and channel_shuffle into the kernel weights."""
    Cb = C // 2
    r = {k: np.asarray(v, np.float32) for k, v in raw.items()}

    # merged first matmul: rows [0:Cb] = (s1-folded) conv1 acting on the SECOND
    # input-channel half; rows [Cb:] = identity/shuffle permutation routing
    # x1[i] -> output channel 2i.
    wa = np.zeros((Cb + C, C), np.float32)
    wa[:Cb, Cb:] = r["w1"] * r["s1"][:, None]
    wa[Cb + 2 * np.arange(Cb), np.arange(Cb)] = 1.0

    # conv2 with s2 folded in, expanded so its output lands on the ODD shuffled
    # channels (even rows stay exactly zero -> relu(0)=0 there).
    w2p = np.zeros((C, Cb), np.float32)
    w2p[1::2] = r["w2"] * r["s2"][:, None]

    # single per-channel column pack: 9 dw taps (sdw folded), b1, bdw, b2.
    colpack = np.zeros((C, 16), np.float32)
    colpack[:Cb, 0:9] = (r["wdw"] * r["sdw"][:, None, None]).reshape(Cb, 9)
    colpack[:Cb, 9] = r["b1"]
    colpack[:Cb, 10] = r["bdw"]
    colpack[1::2, 11] = r["b2"]          # even rows must stay zero (identity lanes)

    return dict(wa=jnp.asarray(wa, jnp.bfloat16),       # bf16 MXU operands
                w2p=jnp.asarray(w2p, jnp.bfloat16),
                colpack=jnp.asarray(colpack))


# ----------------------------- pure-JAX reference -----------------------------

def reference_forward(x, raw):
    N, C, H, W = x.shape
    Cb = C // 2
    x1, x2 = x[:, :Cb], x[:, Cb:]
    hi = jax.lax.Precision.HIGHEST

    def pw(y, w, s, b):
        y = jnp.einsum('oc,nchw->nohw', w, y, precision=hi)
        return jnp.maximum(y * s[None, :, None, None] + b[None, :, None, None], 0.0)

    h = pw(x2, raw["w1"], raw["s1"], raw["b1"])
    hp = jnp.pad(h, ((0, 0), (0, 0), (1, 1), (1, 1)))
    acc = jnp.zeros_like(h)
    for kh in range(3):
        for kw in range(3):
            acc = acc + hp[:, :, kh:kh + H, kw:kw + W] * \
                raw["wdw"][None, :, kh, kw, None, None]
    h = acc * raw["sdw"][None, :, None, None] + raw["bdw"][None, :, None, None]
    h = pw(h, raw["w2"], raw["s2"], raw["b2"])
    out = jnp.concatenate([x1, h], axis=1)
    # channel_shuffle(out, groups=2)
    return out.reshape(N, 2, Cb, H, W).transpose(0, 2, 1, 3, 4).reshape(N, C, H, W)


# ----------------------------- demo / self-check -----------------------------

if __name__ == "__main__":
    key = jax.random.PRNGKey(0)
    kx, kparam = jax.random.split(key)

    # stride=1 ShuffleUnit: in_channels == out_channels == 2 * branch_features
    N, C, H, W = 2, 32, 16, 16
    x = jax.random.normal(kx, (N, C, H, W), jnp.float32)

    raw = init_raw_params(kparam, C)
    kparams = fold_params(raw, C)
    nb = _pick_batch_block(N)

    fwd = jax.jit(shuffle_unit_forward, static_argnames=("nb",))
    out = jax.block_until_ready(fwd(x, kparams, nb=nb))
    assert out.shape == (N, C, H, W)

    ref = jax.block_until_ready(reference_forward(x, raw))
    out_np, ref_np = np.asarray(out), np.asarray(ref)
    max_err = float(np.max(np.abs(out_np - ref_np)))
    # bf16 MXU operands (single-pass matmuls) vs f32 HIGHEST-precision reference.
    assert np.allclose(out_np, ref_np, rtol=3e-2, atol=3e-2), max_err

    print("KERNEL_OK")
</pallas_src>

<mosaic_0001>
module attributes {stable_mosaic.version = 11 : i64} {
  func.func @kernel(%arg0: i32, %arg1: memref<2x32x256xf32, #tpu.memory_space<vmem>>, %arg2: memref<48x32xbf16, #tpu.memory_space<vmem>>, %arg3: memref<32x16xbf16, #tpu.memory_space<vmem>>, %arg4: memref<32x16xf32, #tpu.memory_space<vmem>>, %arg5: memref<4x512xf32, #tpu.memory_space<vmem>>, %arg6: memref<2x32x256xf32, #tpu.memory_space<vmem>>) attributes {dimension_semantics = [#tpu.dimension_semantics<parallel>], iteration_bounds = array<i64: 1>, scalar_prefetch = 0 : i64, scratch_operands = 0 : i64, tpu.core_type = #tpu.core_type<tc>, window_params = [{transform_indices = @transform_0, window_bounds = array<i64: 2, 32, 256>}, {pipeline_mode = #tpu.pipeline_mode<synchronous>, transform_indices = @transform_1, window_bounds = array<i64: 48, 32>}, {pipeline_mode = #tpu.pipeline_mode<synchronous>, transform_indices = @transform_2, window_bounds = array<i64: 32, 16>}, {pipeline_mode = #tpu.pipeline_mode<synchronous>, transform_indices = @transform_3, window_bounds = array<i64: 32, 16>}, {pipeline_mode = #tpu.pipeline_mode<synchronous>, transform_indices = @transform_4, window_bounds = array<i64: 4, 512>}, {transform_indices = @transform_5, window_bounds = array<i64: 2, 32, 256>}]} {
    %c0 = arith.constant 0 : index
    %c0_0 = arith.constant 0 : index
    %c0_1 = arith.constant 0 : index
    %0 = vector.load %arg1[%c0, %c0_0, %c0_1] : memref<2x32x256xf32, #tpu.memory_space<vmem>>, vector<1x32x256xf32>
    %1 = vector.shape_cast %0 : vector<1x32x256xf32> to vector<32x256xf32>
    %c1 = arith.constant 1 : index
    %c0_2 = arith.constant 0 : index
    %c0_3 = arith.constant 0 : index
    %2 = vector.load %arg1[%c1, %c0_2, %c0_3] : memref<2x32x256xf32, #tpu.memory_space<vmem>>, vector<1x32x256xf32>
    %3 = vector.shape_cast %2 : vector<1x32x256xf32> to vector<32x256xf32>
    %4 = tpu.concatenate %1, %3 in 1 : vector<32x256xf32>, vector<32x256xf32> -> vector<32x512xf32>
    %c0_4 = arith.constant 0 : index
    %c0_5 = arith.constant 0 : index
    %5 = vector.load %arg4[%c0_4, %c0_5] : memref<32x16xf32, #tpu.memory_space<vmem>>, vector<32x16xf32>
    %6 = vector.extract_strided_slice %5 {offsets = [0, 0], sizes = [16, 9], strides = [1, 1]} : vector<32x16xf32> to vector<16x9xf32>
    %7 = vector.extract_strided_slice %5 {offsets = [0, 9], sizes = [16, 1], strides = [1, 1]} : vector<32x16xf32> to vector<16x1xf32>
    %8 = vector.extract_strided_slice %5 {offsets = [0, 10], sizes = [16, 1], strides = [1, 1]} : vector<32x16xf32> to vector<16x1xf32>
    %9 = vector.extract_strided_slice %5 {offsets = [0, 11], sizes = [32, 1], strides = [1, 1]} : vector<32x16xf32> to vector<32x1xf32>
    %c0_6 = arith.constant 0 : index
    %c0_7 = arith.constant 0 : index
    %10 = vector.load %arg2[%c0_6, %c0_7] : memref<48x32xbf16, #tpu.memory_space<vmem>>, vector<48x32xbf16>
    %11 = arith.truncf %4 : vector<32x512xf32> to vector<32x512xbf16>
    %cst = arith.constant dense<0.000000e+00> : vector<48x512xf32>
    %12 = tpu.matmul %10, %11, %cst {dimension_numbers = #tpu.dot_dimension_numbers<[1], [0], [0], [1], [0, 0, 1, 1], [], []>} : vector<48x32xbf16>, vector<32x512xbf16>, vector<48x512xf32> -> vector<48x512xf32>
    %13 = vector.extract_strided_slice %12 {offsets = [0, 0], sizes = [16, 512], strides = [1, 1]} : vector<48x512xf32> to vector<16x512xf32>
    %14 = vector.broadcast %7 : vector<16x1xf32> to vector<16x512xf32>
    %15 = arith.addf %13, %14 : vector<16x512xf32>
    %cst_8 = arith.constant 0.000000e+00 : f32
    %16 = vector.broadcast %cst_8 : f32 to vector<16x512xf32>
    %17 = arith.maximumf %15, %16 : vector<16x512xf32>
    %18 = vector.extract_strided_slice %12 {offsets = [16, 0], sizes = [32, 512], strides = [1, 1]} : vector<48x512xf32> to vector<32x512xf32>
    %c0_9 = arith.constant 0 : index
    %c0_10 = arith.constant 0 : index
    %19 = vector.load %arg5[%c0_9, %c0_10] : memref<4x512xf32, #tpu.memory_space<vmem>>, vector<4x512xf32>
    %20 = vector.extract_strided_slice %19 {offsets = [0, 0], sizes = [1, 512], strides = [1, 1]} : vector<4x512xf32> to vector<1x512xf32>
    %21 = vector.extract_strided_slice %19 {offsets = [1, 0], sizes = [1, 512], strides = [1, 1]} : vector<4x512xf32> to vector<1x512xf32>
    %22 = vector.extract_strided_slice %19 {offsets = [2, 0], sizes = [1, 512], strides = [1, 1]} : vector<4x512xf32> to vector<1x512xf32>
    %23 = vector.extract_strided_slice %19 {offsets = [3, 0], sizes = [1, 512], strides = [1, 1]} : vector<4x512xf32> to vector<1x512xf32>
    %c1_i32 = arith.constant 1 : i32
    %24 = tpu.dynamic_rotate %17 by %c1_i32 dim 1 : vector<16x512xf32>, i32 -> vector<16x512xf32>
    %25 = vector.broadcast %20 : vector<1x512xf32> to vector<16x512xf32>
    %26 = arith.mulf %24, %25 : vector<16x512xf32>
    %c511_i32 = arith.constant 511 : i32
    %27 = tpu.dynamic_rotate %17 by %c511_i32 dim 1 : vector<16x512xf32>, i32 -> vector<16x512xf32>
    %28 = vector.broadcast %21 : vector<1x512xf32> to vector<16x512xf32>
    %29 = arith.mulf %27, %28 : vector<16x512xf32>
    %30 = vector.extract_strided_slice %6 {offsets = [0, 3], sizes = [16, 1], strides = [1, 1]} : vector<16x9xf32> to vector<16x1xf32>
    %31 = vector.broadcast %30 : vector<16x1xf32> to vector<16x512xf32>
    %32 = arith.mulf %26, %31 : vector<16x512xf32>
    %33 = vector.extract_strided_slice %6 {offsets = [0, 4], sizes = [16, 1], strides = [1, 1]} : vector<16x9xf32> to vector<16x1xf32>
    %34 = vector.broadcast %33 : vector<16x1xf32> to vector<16x512xf32>
    %35 = arith.mulf %17, %34 : vector<16x512xf32>
    %36 = arith.addf %32, %35 : vector<16x512xf32>
    %37 = vector.extract_strided_slice %6 {offsets = [0, 5], sizes = [16, 1], strides = [1, 1]} : vector<16x9xf32> to vector<16x1xf32>
    %38 = vector.broadcast %37 : vector<16x1xf32> to vector<16x512xf32>
    %39 = arith.mulf %29, %38 : vector<16x512xf32>
    %40 = arith.addf %36, %39 : vector<16x512xf32>
    %41 = vector.broadcast %8 : vector<16x1xf32> to vector<16x512xf32>
    %42 = arith.addf %40, %41 : vector<16x512xf32>
    %43 = vector.extract_strided_slice %6 {offsets = [0, 0], sizes = [16, 1], strides = [1, 1]} : vector<16x9xf32> to vector<16x1xf32>
    %44 = vector.broadcast %43 : vector<16x1xf32> to vector<16x512xf32>
    %45 = arith.mulf %26, %44 : vector<16x512xf32>
    %46 = vector.extract_strided_slice %6 {offsets = [0, 1], sizes = [16, 1], strides = [1, 1]} : vector<16x9xf32> to vector<16x1xf32>
    %47 = vector.broadcast %46 : vector<16x1xf32> to vector<16x512xf32>
    %48 = arith.mulf %17, %47 : vector<16x512xf32>
    %49 = arith.addf %45, %48 : vector<16x512xf32>
    %50 = vector.extract_strided_slice %6 {offsets = [0, 2], sizes = [16, 1], strides = [1, 1]} : vector<16x9xf32> to vector<16x1xf32>
    %51 = vector.broadcast %50 : vector<16x1xf32> to vector<16x512xf32>
    %52 = arith.mulf %29, %51 : vector<16x512xf32>
    %53 = arith.addf %49, %52 : vector<16x512xf32>
    %c16_i32 = arith.constant 16 : i32
    %54 = tpu.dynamic_rotate %53 by %c16_i32 dim 1 : vector<16x512xf32>, i32 -> vector<16x512xf32>
    %55 = vector.broadcast %22 : vector<1x512xf32> to vector<16x512xf32>
    %56 = arith.mulf %54, %55 : vector<16x512xf32>
    %57 = arith.addf %42, %56 : vector<16x512xf32>
    %58 = vector.extract_strided_slice %6 {offsets = [0, 6], sizes = [16, 1], strides = [1, 1]} : vector<16x9xf32> to vector<16x1xf32>
    %59 = vector.broadcast %58 : vector<16x1xf32> to vector<16x512xf32>
    %60 = arith.mulf %26, %59 : vector<16x512xf32>
    %61 = vector.extract_strided_slice %6 {offsets = [0, 7], sizes = [16, 1], strides = [1, 1]} : vector<16x9xf32> to vector<16x1xf32>
    %62 = vector.broadcast %61 : vector<16x1xf32> to vector<16x512xf32>
    %63 = arith.mulf %17, %62 : vector<16x512xf32>
    %64 = arith.addf %60, %63 : vector<16x512xf32>
    %65 = vector.extract_strided_slice %6 {offsets = [0, 8], sizes = [16, 1], strides = [1, 1]} : vector<16x9xf32> to vector<16x1xf32>
    %66 = vector.broadcast %65 : vector<16x1xf32> to vector<16x512xf32>
    %67 = arith.mulf %29, %66 : vector<16x512xf32>
    %68 = arith.addf %64, %67 : vector<16x512xf32>
    %c496_i32 = arith.constant 496 : i32
    %69 = tpu.dynamic_rotate %68 by %c496_i32 dim 1 : vector<16x512xf32>, i32 -> vector<16x512xf32>
    %70 = vector.broadcast %23 : vector<1x512xf32> to vector<16x512xf32>
    %71 = arith.mulf %69, %70 : vector<16x512xf32>
    %72 = arith.addf %57, %71 : vector<16x512xf32>
    %c0_11 = arith.constant 0 : index
    %c0_12 = arith.constant 0 : index
    %73 = vector.load %arg3[%c0_11, %c0_12] : memref<32x16xbf16, #tpu.memory_space<vmem>>, vector<32x16xbf16>
    %74 = arith.truncf %72 : vector<16x512xf32> to vector<16x512xbf16>
    %cst_13 = arith.constant dense<0.000000e+00> : vector<32x512xf32>
    %75 = tpu.matmul %73, %74, %cst_13 {dimension_numbers = #tpu.dot_dimension_numbers<[1], [0], [0], [1], [0, 0, 1, 1], [], []>} : vector<32x16xbf16>, vector<16x512xbf16>, vector<32x512xf32> -> vector<32x512xf32>
    %76 = vector.broadcast %9 : vector<32x1xf32> to vector<32x512xf32>
    %77 = arith.addf %75, %76 : vector<32x512xf32>
    %cst_14 = arith.constant 0.000000e+00 : f32
    %78 = vector.broadcast %cst_14 : f32 to vector<32x512xf32>
    %79 = arith.maximumf %77, %78 : vector<32x512xf32>
    %80 = arith.addf %18, %79 : vector<32x512xf32>
    %81 = vector.extract_strided_slice %80 {offsets = [0, 0], sizes = [32, 256], strides = [1, 1]} : vector<32x512xf32> to vector<32x256xf32>
    %c0_15 = arith.constant 0 : index
    %c0_16 = arith.constant 0 : index
    %c0_17 = arith.constant 0 : index
    %82 = vector.load %arg6[%c0_15, %c0_16, %c0_17] : memref<2x32x256xf32, #tpu.memory_space<vmem>>, vector<1x32x256xf32>
    %83 = vector.shape_cast %82 : vector<1x32x256xf32> to vector<32x256xf32>
    %84 = vector.shape_cast %81 : vector<32x256xf32> to vector<1x32x256xf32>
    tpu.vector_store %arg6[%c0_15, %c0_16, %c0_17], %84 {strides = array<i32>} : memref<2x32x256xf32, #tpu.memory_space<vmem>>, vector<1x32x256xf32>,
    %85 = vector.extract_strided_slice %80 {offsets = [0, 256], sizes = [32, 256], strides = [1, 1]} : vector<32x512xf32> to vector<32x256xf32>
    %c1_18 = arith.constant 1 : index
    %c0_19 = arith.constant 0 : index
    %c0_20 = arith.constant 0 : index
    %86 = vector.load %arg6[%c1_18, %c0_19, %c0_20] : memref<2x32x256xf32, #tpu.memory_space<vmem>>, vector<1x32x256xf32>
    %87 = vector.shape_cast %86 : vector<1x32x256xf32> to vector<32x256xf32>
    %88 = vector.shape_cast %85 : vector<32x256xf32> to vector<1x32x256xf32>
    tpu.vector_store %arg6[%c1_18, %c0_19, %c0_20], %88 {strides = array<i32>} : memref<2x32x256xf32, #tpu.memory_space<vmem>>, vector<1x32x256xf32>,
    return
  }
  func.func @transform_0(%arg0: i32) -> (i32, i32, i32) {
    %c0_i32 = arith.constant 0 : i32
    %c0_i32_0 = arith.constant 0 : i32
    %c0_i32_1 = arith.constant 0 : i32
    return %arg0, %c0_i32, %c0_i32_0 : i32, i32, i32
  }
  func.func @transform_1(%arg0: i32) -> (i32, i32) {
    %c0_i32 = arith.constant 0 : i32
    %c0_i32_0 = arith.constant 0 : i32
    %c0_i32_1 = arith.constant 0 : i32
    return %c0_i32, %c0_i32_0 : i32, i32
  }
  func.func @transform_2(%arg0: i32) -> (i32, i32) {
    %c0_i32 = arith.constant 0 : i32
    %c0_i32_0 = arith.constant 0 : i32
    %c0_i32_1 = arith.constant 0 : i32
    return %c0_i32, %c0_i32_0 : i32, i32
  }
  func.func @transform_3(%arg0: i32) -> (i32, i32) {
    %c0_i32 = arith.constant 0 : i32
    %c0_i32_0 = arith.constant 0 : i32
    %c0_i32_1 = arith.constant 0 : i32
    return %c0_i32, %c0_i32_0 : i32, i32
  }
  func.func @transform_4(%arg0: i32) -> (i32, i32) {
    %c0_i32 = arith.constant 0 : i32
    %c0_i32_0 = arith.constant 0 : i32
    %c0_i32_1 = arith.constant 0 : i32
    return %c0_i32, %c0_i32_0 : i32, i32
  }
  func.func @transform_5(%arg0: i32) -> (i32, i32, i32) {
    %c0_i32 = arith.constant 0 : i32
    %c0_i32_0 = arith.constant 0 : i32
    %c0_i32_1 = arith.constant 0 : i32
    return %arg0, %c0_i32, %c0_i32_0 : i32, i32, i32
  }
}

</mosaic_0001>

<bundles_post_ra>
// kernel: shuffle_unit_forward.1
= control target key start
LH: loop header
LB: loop body
LE: loop exit
PB: predicated region body
PF: predicated region fallthrough
CT: control target
= control target key end

     0   :  { %v1628_v3 = vmov 0   ;;  %v1013_v8 = vmov 9   ;;  %vm71_vm0 = vcmask 261120   ;;  %v1014_v29 = vmov 1   ;;  %s1019_s30 = smov 1   ;;  %s1020_s6 = smov 127   ;;  %s1622_s0 = inlined_call_operand.vmem [shape: f32[2,32,256], index: 0, kind: input, shape index: {}]   ;;  %s1623_s1 = inlined_call_operand.vmem [shape: bf16[48,32], index: 1, kind: input, shape index: {}]   ;;  %s1624_s3 = inlined_call_operand.vmem [shape: f32[32,16], index: 3, kind: input, shape index: {}]   ;;  %s1625_s4 = inlined_call_operand.vmem [shape: f32[4,512], index: 4, kind: input, shape index: {}]   ;;  %s1626_s2 = inlined_call_operand.vmem [shape: bf16[32,16], index: 2, kind: input, shape index: {}]   ;;  %s1627_s5 = inlined_call_operand.vmem [shape: f32[2,32,256], index: 5, kind: output, shape index: {}]  }
   0x1   :  { %v26_v0 = vld [vmem:[%s1622_s0 + $0x28] sm:$0xff]  ;;  %v28_v1 = vld [vmem:[%s1622_s0 + $0x38] sm:$0xff]  ;;  %113 = vmatprep.mubr.bf16.mxu0 %v1628_v3  ;;  %176 = vmatprep.mubr.bf16.mxu1 %v1628_v3  ;;  %v25_v6 = vld [vmem:[%s1622_s0 + $0x20] sm:$0xff]  ;;  %v1015_v30 = vmov 2   ;;  %v1016_v31 = vmov 6   ;;  %v1017_v32 = vmov 7  }
   0x2   :  { %v946_v2 = vld [vmem:[%s1622_s0 + $0x68] sm:$0xff]  ;;  %v53_v4 = vpack.c.bf16 %v28_v1, %v26_v0  ;;  %v948_v5 = vld [vmem:[%s1622_s0 + $0x78] sm:$0xff]  ;;  %v27_v7 = vld [vmem:[%s1622_s0 + $0x30] sm:$0xff]  ;;  %989 = vset.pattern.permute.xlu1 %v1628_v3  ;;  %988 = vset.pattern.permute.xlu0 %v1013_v8  ;;  %v1018_v33 = vmov 8   ;;  %v1021_v60 = vmov 3   ;;  %v1022_v61 = vmov 4  }
   0x3   :  { %v55_v9 = vpack.c.bf16 %v948_v5, %v946_v2  ;;  %v52_v10 = vpack.c.bf16 %v27_v7, %v25_v6  ;;  %v945_v11 = vld [vmem:[%s1622_s0 + $0x60] sm:$0xff]  ;;  %v947_v12 = vld [vmem:[%s1622_s0 + $0x70] sm:$0xff]  ;;  %v22_v13 = vld [vmem:[%s1622_s0 + $0x8] sm:$0xff]  ;;  %v1023_v62 = vmov 5   ;;  %v1024_v63 = vmov 10   ;;  %s1026_s13 = smov 112  }
   0x4   :  { %93 = vmatprep.subr.bf16.mxu0 %v53_v4  ;;  %v54_v14 = vpack.c.bf16 %v947_v12, %v945_v11  ;;  %v24_v15 = vld [vmem:[%s1622_s0 + $0x18] sm:$0xff]  ;;  %v942_v16 = vld [vmem:[%s1622_s0 + $0x48] sm:$0xff]  ;;  %v21_v20 = vld [vmem:[%s1622_s0] sm:$0xff]  ;;  %vm775_vm5 = vcmask 130048  }
   0x5   :  { %v944_v17 = vld [vmem:[%s1622_s0 + $0x58] sm:$0xff]  ;;  %156 = vmatprep.subr.bf16.mxu1 %v55_v9  ;;  %94 = vmatpush1.bf16.msra.mxu0 %v52_v10  ;;  %v49_v18 = vpack.c.bf16 %v24_v15, %v22_v13  ;;  %v23_v21 = vld [vmem:[%s1622_s0 + $0x10] sm:$0xff]  ;;  %v941_v22 = vld [vmem:[%s1622_s0 + $0x40] sm:$0xff] }
   0x6   :  { %v51_v19 = vpack.c.bf16 %v944_v17, %v942_v16  ;;  %157 = vmatpush1.bf16.msra.mxu1 %v54_v14  ;;  %v48_v23 = vpack.c.bf16 %v23_v21, %v21_v20  ;;  %v943_v24 = vld [vmem:[%s1622_s0 + $0x50] sm:$0xff]  ;;  %v1007_v26 = vld [vmem:[%s1623_s1] sm:$0xff]   ;;  %v1122_v28 = vld [vmem:[%s1624_s3 + $0x8] sm:$0xff]  ;;  %v251_v14 = vlaneseq }
   0x7   :  { %95 = vmatprep.subr.bf16.mxu0 %v49_v18  ;;  %v50_v25 = vpack.c.bf16 %v943_v24, %v941_v22  ;;  %v1115_v27 = vld [vmem:[%s1624_s3] sm:$0xff] }
   0x8   :  { %158 = vmatprep.subr.bf16.mxu1 %v51_v19  ;;  %458 = vperm.xlu1 %989, %v1115_v27   ;;  %v1206_v17 = vshrl.u32 %v251_v14, 7  ;;  %v1216_v21 = vld [vmem:[%s1625_s4] sm:$0xff]  ;;  %v1224_v24 = vand.u32 127, %v251_v14 }
   0x9   :  { %209 = vperm.xlu0 %988, %v1115_v27   ;;  %96 = vmatpush1.bf16.msra.mxu0 %v48_v23  ;;  %1637 = vst [vmem:[#allocation3_spill] sm:$0xff] %v1216_v21  ;;  %v1222_v23 = vld [vmem:[%s1625_s4 + $0x8] sm:$0xff]  ;;  %s1025_s4 = smov 16  }
   0xa   :  { %159 = vmatpush1.bf16.msra.mxu1 %v50_v25  ;;  %1636 = vst [vmem:[#allocation2_spill] sm:$0xff] %v1206_v17  ;;  %v266_v20 = vsub.s32 0, %v1206_v17  ;;  %v270_v22 = vsub.s32 4, %v1206_v17  ;;  %1638 = vst [vmem:[#allocation4_spill] sm:$0xff] %v1222_v23  ;;  %vm253_vm1 = vcmp.lt.s32.totalorder %v1224_v24, 1  ;;  %vm324_vm2 = vcmp.lt.s32.totalorder %v1224_v24, 127 }
   0xb   :  { %vm537_vm3 = vcmp.lt.s32.totalorder %v1224_v24, 16  ;;  %vm678_vm4 = vcmp.lt.s32.totalorder %v1224_v24, 112  ;;  %v1011_v24 = vld [vmem:[%s1626_s2 + $0x8] sm:$0xff]  }
   0xc   :  { %952 = vmatmul.mubr.msk.bf16.vlgmr.msra.gmra.mxu0 %vm71_vm0, %v1007_v26  ;;  %462 = vperm.xlu1 %989, %v1122_v28  }
   0xd   :  { %955 = vmatmul.mubr.msk.bf16.vlgmr.msra.gmra.mxu1 %vm71_vm0, %v1007_v26  ;;  %214 = vperm.xlu0 %988, %v1122_v28  }
   0xe   :  { %123 = vmatprep.mubr.bf16.mxu0 %v1628_v3  ;;  %186 = vmatprep.mubr.bf16.mxu1 %v1628_v3 }
  0x10   :  { %991 = vset.pattern.permute.xlu1 %v1014_v29 }
  0x11   :  { %478 = vperm.xlu1 %991, %v1122_v28   ;;  %990 = vset.pattern.permute.xlu0 %v1014_v29  ;;  %v267_v29 = vrot.slane %v1216_v21, %v266_v20 }
  0x12   :  { %474 = vperm.xlu0 %990, %v1115_v27  }
  0x15   :  { %992 = vset.pattern.permute.xlu1 %v1015_v30 }
  0x16   :  { %498 = vperm.xlu1 %992, %v1115_v27   ;;  %993 = vset.pattern.permute.xlu0 %v1015_v30  ;;  %v335_v30 = vsub.s32 1, %v1206_v17 }
  0x17   :  { %502 = vperm.xlu0 %993, %v1122_v28  }
  0x1a   :  { %994 = vset.pattern.permute.xlu1 %v1016_v31  ;;  %v339_v31 = vsub.s32 5, %v1206_v17 }
  0x1b   :  { %599 = vperm.xlu1 %994, %v1115_v27   ;;  %995 = vset.pattern.permute.xlu0 %v1017_v32 }
  0x1c   :  { %615 = vperm.xlu0 %995, %v1115_v27  }
  0x1f   :  { %603 = vperm.xlu1 %994, %v1122_v28  }
  0x20   :  { %998 = vset.pattern.permute.xlu0 %v1018_v33 }
  0x23   :  { %996 = vset.pattern.permute.xlu1 %v1017_v32  ;;  %v271_v32 = vrot.slane %v1216_v21, %v270_v22 }
  0x24   :  { %619 = vperm.xlu1 %996, %v1122_v28  }
  0x28   :  { %997 = vset.pattern.permute.xlu1 %v1018_v33  ;;  %v275_v33 = vrot.slane %v1222_v23, %v266_v20 }
  0x83   :  { %v1180_v0 = vpop.permute.xlu1 %458 }
  0x84   :  { %v210_v34 = vpop.permute.xlu0 %209 }
  0x87   :  { %v1182_v1 = vpop.permute.xlu1 %462 }
  0x88   :  { %v215_v42 = vpop.permute.xlu0 %214 }
  0x8c   :  { %v1184_v2 = vpop.permute.xlu1 %478 }
  0x8d   :  { %v1190_v6 = vpop.permute.xlu0 %474 }
  0x91   :  { %v1186_v4 = vpop.permute.xlu1 %498 }
  0x92   :  { %v1194_v8 = vpop.permute.xlu0 %502 }
  0x96   :  { %v1188_v5 = vpop.permute.xlu1 %599 }
  0x97   :  { %v1198_v10 = vpop.permute.xlu0 %615 }
  0x9a   :  { %v1192_v7 = vpop.permute.xlu1 %603 }
  0x9f   :  { %v1196_v9 = vpop.permute.xlu1 %619 }
  0xcc   :  { %v115_v35 = vpop.f32.mrf.mxu0 }
  0xcd   :  { %v217_v36 = vadd.f32 %v210_v34, %v115_v35  ;;  %v178_v37 = vpop.f32.mrf.mxu1 }
  0xce   :  { %v117_v38 = vpop.f32.mrf.mxu0  ;;  %v219_v40 = vadd.f32 %v210_v34, %v178_v37  ;;  %v336_v37 = vrot.slane %v1216_v21, %v335_v30 }
  0xcf   :  { %v1138_v39 = vmax.f32 %v217_v36, 0.0  ;;  %v180_v41 = vpop.f32.mrf.mxu1  ;;  %v218_v50 = vadd.f32 %v210_v34, %v117_v38  ;;  %v279_v38 = vrot.slane %v1222_v23, %v270_v22 }
  0xd0   :  { %v119_v43 = vpop.f32.mrf.mxu0  ;;  %v1141_v46 = vmax.f32 %v219_v40, 0.0  ;;  %v220_v53 = vadd.f32 %v210_v34, %v180_v41  ;;  %v287_v34 = vrot.slane %v267_v29, %v266_v20 }
  0xd1   :  { %v221_v44 = vadd.f32 %v215_v42, %v119_v43  ;;  %v182_v45 = vpop.f32.mrf.mxu1  ;;  %235 = vrot.lane.b32.xlu1 %v1138_v39, %s1019_s30  ;;  %v1153_v52 = vmax.f32 %v218_v50, 0.0  ;;  %v1240_v41 = vmul.f32 %v1198_v10, %v1138_v39  ;;  %v340_v43 = vrot.slane %v1216_v21, %v339_v31 }
  0xd2   :  { %v223_v48 = vadd.f32 %v215_v42, %v182_v45  ;;  %v121_v51 = vpop.f32.mrf.mxu0  ;;  %v1157_v56 = vmax.f32 %v220_v53, 0.0  ;;  %v295_v45 = vrot.slane %v275_v33, %v266_v20  ;;  %v356_v53 = vrot.slane %v336_v37, %v335_v30 }
  0xd3   :  { %v1143_v47 = vmax.f32 %v221_v44, 0.0  ;;  %v222_v54 = vadd.f32 %v215_v42, %v121_v51  ;;  %v184_v55 = vpop.f32.mrf.mxu1  ;;  %v291_v44 = vrot.slane %v271_v32, %v266_v20 }
  0xd4   :  { %v1147_v49 = vmax.f32 %v223_v48, 0.0  ;;  %v224_v58 = vadd.f32 %v215_v42, %v184_v55  ;;  %v1244_v42 = vmul.f32 %v1198_v10, %v1141_v46  ;;  %v481_v48 = vmul.f32 %v1190_v6, %v1138_v39 }
  0xd5   :  { %243 = vrot.lane.b32.xlu1 %v1141_v46, %s1019_s30  ;;  %237 = vrot.lane.b32.xlu0 %v1143_v47, %s1019_s30  ;;  %v1159_v57 = vmax.f32 %v222_v54, 0.0 }
  0xd6   :  { %v1163_v59 = vmax.f32 %v224_v58, 0.0  ;;  %v344_v58 = vrot.slane %v1222_v23, %v335_v30 }
  0xd7   :  { %v486_v3 = vmul.f32 %v1184_v2, %v1159_v57 }
  0xd9   :  { %308 = vrot.lane.b32.xlu1 %v1138_v39, %s1020_s6  ;;  %245 = vrot.lane.b32.xlu0 %v1147_v49, %s1019_s30 }
  0xdd   :  { %316 = vrot.lane.b32.xlu1 %v1141_v46, %s1020_s6  ;;  %310 = vrot.lane.b32.xlu0 %v1143_v47, %s1020_s6 }
  0xe1   :  { %239 = vrot.lane.b32.xlu1 %v1153_v52, %s1019_s30  ;;  %318 = vrot.lane.b32.xlu0 %v1147_v49, %s1020_s6 }
  0xe5   :  { %247 = vrot.lane.b32.xlu1 %v1157_v56, %s1019_s30  ;;  %241 = vrot.lane.b32.xlu0 %v1159_v57, %s1019_s30 }
  0xe9   :  { %312 = vrot.lane.b32.xlu1 %v1153_v52, %s1020_s6  ;;  %249 = vrot.lane.b32.xlu0 %v1163_v59, %s1019_s30 }
  0xed   :  { %320 = vrot.lane.b32.xlu1 %v1157_v56, %s1020_s6  ;;  %314 = vrot.lane.b32.xlu0 %v1159_v57, %s1020_s6 }
  0xf1   :  { %639 = vperm.xlu1 %997, %v1115_v27   ;;  %322 = vrot.lane.b32.xlu0 %v1163_v59, %s1020_s6 }
  0xf5   :  { %999 = vset.pattern.permute.xlu1 %v1021_v60  ;;  %643 = vperm.xlu0 %998, %v1122_v28   ;;  %v299_v60 = vrot.slane %v279_v38, %v266_v20 }
  0xf6   :  { %378 = vperm.xlu1 %999, %v1115_v27  }
  0xf9   :  { %1000 = vset.pattern.permute.xlu0 %v1022_v61 }
  0xfa   :  { %382 = vperm.xlu1 %999, %v1122_v28   ;;  %394 = vperm.xlu0 %1000, %v1115_v27  }
  0xfe   :  { %1001 = vset.pattern.permute.xlu1 %v1022_v61  ;;  %1003 = vset.pattern.permute.xlu0 %v1023_v62  ;;  %v348_v61 = vrot.slane %v1222_v23, %v339_v31 }
  0xff   :  { %398 = vperm.xlu1 %1001, %v1122_v28   ;;  %422 = vperm.xlu0 %1003, %v1122_v28  }
 0x103   :  { %1002 = vset.pattern.permute.xlu1 %v1023_v62  ;;  %v482_v62 = vmul.f32 %v1190_v6, %v1153_v52 }
 0x104   :  { %418 = vperm.xlu1 %1002, %v1115_v27  }
 0x108   :  { %1004 = vset.pattern.permute.xlu1 %v1024_v63  ;;  %v485_v63 = vmul.f32 %v1184_v2, %v1143_v47 }
 0x109   :  { %442 = vperm.xlu1 %1004, %v1115_v27  }
 0x10d   :  { %446 = vperm.xlu1 %1004, %v1122_v28  }
 0x143   :  { %v236_v11 = vpop.permute.xlu1 %235 }
 0x147   :  { %v1200_v12 = vpop.permute.xlu1 %243  ;;  %v238_v13 = vpop.permute.xlu0 %237 }
 0x14b   :  { %v1202_v15 = vpop.permute.xlu1 %308  ;;  %v1204_v16 = vpop.permute.xlu0 %245 }
 0x14f   :  { %v1208_v18 = vpop.permute.xlu1 %316  ;;  %v1210_v19 = vpop.permute.xlu0 %310 }
 0x153   :  { %v240_v25 = vpop.permute.xlu1 %239  ;;  %v1226_v26 = vpop.permute.xlu0 %318 }
 0x154   :  { %v258_v50 = vsel %vm253_vm1, %v236_v11, %v240_v25  ;;  %v256_v20 = vsel %vm253_vm1, %v240_v25, %v1200_v12 }
 0x155   :  { %v1270_v31 = vmul.f32 %v291_v44, %v258_v50 }
 0x157   :  { %v248_v35 = vpop.permute.xlu1 %247  ;;  %v242_v36 = vpop.permute.xlu0 %241 }
 0x158   :  { %v260_v40 = vsel %vm253_vm1, %v248_v35, %v236_v11  ;;  %v259_v14 = vsel %vm253_vm1, %v238_v13, %v242_v36  ;;  %v360_v11 = vrot.slane %v340_v43, %v335_v30  ;;  %v257_v25 = vsel %vm253_vm1, %v242_v36, %v1204_v16 }
 0x159   :  { %v1252_v51 = vmul.f32 %v287_v34, %v260_v40  ;;  %v364_v40 = vrot.slane %v344_v58, %v335_v30  ;;  %v1286_v50 = vmul.f32 %v291_v44, %v259_v14  ;;  %v466_v36 = vmul.f32 %v1180_v0, %v1270_v31 }
 0x15a   :  { %v254_v14 = vsel %vm253_vm1, %v1200_v12, %v248_v35 }
 0x15b   :  { %v313_v54 = vpop.permute.xlu1 %312  ;;  %v250_v55 = vpop.permute.xlu0 %249  ;;  %v465_v37 = vmul.f32 %v1180_v0, %v1252_v51  ;;  %v470_v17 = vmul.f32 %v1182_v1, %v1286_v50 }
 0x15c   :  { %v329_v22 = vsel %vm324_vm2, %v1202_v15, %v313_v54  ;;  %v261_v29 = vsel %vm253_vm1, %v250_v55, %v238_v13  ;;  %v327_v32 = vsel %vm324_vm2, %v313_v54, %v1208_v18  ;;  %v368_v54 = vrot.slane %v348_v61, %v335_v30 }
 0x15d   :  { %v1275_v33 = vmul.f32 %v287_v34, %v261_v29  ;;  %v1279_v38 = vmul.f32 %v356_v53, %v329_v22  ;;  %v1290_v29 = vmul.f32 %v295_v45, %v256_v20  ;;  %v1292_v22 = vmul.f32 %v360_v11, %v327_v32 }
 0x15e   :  { %v1312_v20 = vmul.f32 %v295_v45, %v257_v25  ;;  %v489_v32 = vadd.f32 %v481_v48, %v465_v37  ;;  %v255_v12 = vsel %vm253_vm1, %v1204_v16, %v250_v55  ;;  %v1339_v16 = vmul.f32 %v299_v60, %v254_v14 }
 0x15f   :  { %v321_v43 = vpop.permute.xlu1 %320  ;;  %v315_v13 = vpop.permute.xlu0 %314  ;;  %v469_v34 = vmul.f32 %v1182_v1, %v1275_v33  ;;  %v506_v48 = vmul.f32 %v1186_v4, %v1292_v22  ;;  %v467_v25 = vmul.f32 %v1180_v0, %v1290_v29 }
 0x160   :  { %v328_v58 = vsel %vm324_vm2, %v315_v13, %v1226_v26  ;;  %v330_v23 = vsel %vm324_vm2, %v1210_v19, %v315_v13  ;;  %v325_v44 = vsel %vm324_vm2, %v1208_v18, %v321_v43  ;;  %v505_v13 = vmul.f32 %v1186_v4, %v1279_v38 }
 0x161   :  { %v1305_v30 = vmul.f32 %v356_v53, %v330_v23  ;;  %v1307_v61 = vmul.f32 %v360_v11, %v328_v58  ;;  %v493_v23 = vadd.f32 %v485_v63, %v469_v34  ;;  %v1326_v35 = vmul.f32 %v364_v40, %v325_v44 }
 0x162   :  { %v513_v45 = vadd.f32 %v505_v13, %v489_v32  ;;  %v331_v11 = vsel %vm324_vm2, %v321_v43, %v1202_v15  ;;  %v490_v34 = vadd.f32 %v482_v62, %v466_v36  ;;  %v623_v15 = vmul.f32 %v1198_v10, %v1153_v52 }
 0x163   :  { %v323_v21 = vpop.permute.xlu0 %322  ;;  %v509_v53 = vmul.f32 %v1194_v8, %v1305_v30  ;;  %v510_v63 = vmul.f32 %v1194_v8, %v1307_v61  ;;  %v1349_v43 = vmul.f32 %v299_v60, %v255_v12  ;;  %v494_v58 = vadd.f32 %v486_v3, %v470_v17 }
 0x164   :  { %v326_v18 = vsel %vm324_vm2, %v1226_v26, %v323_v21  ;;  %521 = vrot.lane.b32.xlu0 %v513_v45, %s1025_s4  ;;  %v332_v55 = vsel %vm324_vm2, %v323_v21, %v1210_v19  ;;  %v1352_v44 = vmul.f32 %v368_v54, %v331_v11  ;;  %v514_v14 = vadd.f32 %v506_v48, %v490_v34 }
 0x165   :  { %v1333_v37 = vmul.f32 %v364_v40, %v326_v18  ;;  %v517_v26 = vadd.f32 %v509_v53, %v493_v23  ;;  %v471_v40 = vmul.f32 %v1182_v1, %v1312_v20  ;;  %v483_v32 = vmul.f32 %v1190_v6, %v1141_v46 }
 0x166   :  { %v507_v19 = vmul.f32 %v1186_v4, %v1326_v35  ;;  %v1358_v21 = vmul.f32 %v368_v54, %v332_v55  ;;  %v518_v62 = vadd.f32 %v510_v63, %v494_v58  ;;  %v487_v36 = vmul.f32 %v1184_v2, %v1147_v49 }
 0x167   :  { %523 = vrot.lane.b32.xlu1 %v517_v26, %s1025_s4  ;;  %v511_v60 = vmul.f32 %v1194_v8, %v1333_v37  ;;  %v625_v3 = vmul.f32 %v1198_v10, %v1157_v56  ;;  %v626_v17 = vmul.f32 %v1196_v9, %v1143_v47  ;;  %v468_v13 = vmul.f32 %v1180_v0, %v1339_v16 }
 0x168   :  { %525 = vrot.lane.b32.xlu0 %v514_v14, %s1025_s4  ;;  %v491_v54 = vadd.f32 %v483_v32, %v467_v25  ;;  %v628_v18 = vmul.f32 %v1196_v9, %v1147_v49  ;;  %v607_v23 = vmul.f32 %v1188_v5, %v1270_v31  ;;  %v472_v53 = vmul.f32 %v1182_v1, %v1349_v43 }
 0x169   :  { %v495_v12 = vadd.f32 %v487_v36, %v471_v40  ;;  %v627_v45 = vmul.f32 %v1196_v9, %v1159_v57  ;;  %v484_v48 = vmul.f32 %v1190_v6, %v1157_v56  ;;  %v508_v11 = vmul.f32 %v1186_v4, %v1352_v44 }
 0x16a   :  { %v515_v0 = vadd.f32 %v507_v19, %v491_v54  ;;  %v608_v26 = vmul.f32 %v1188_v5, %v1290_v29  ;;  %v488_v1 = vmul.f32 %v1184_v2, %v1163_v59  ;;  %v512_v25 = vmul.f32 %v1194_v8, %v1358_v21 }
 0x16b   :  { %527 = vrot.lane.b32.xlu1 %v518_v62, %s1025_s4  ;;  %v519_v63 = vadd.f32 %v511_v60, %v495_v12  ;;  %v606_v55 = vmul.f32 %v1188_v5, %v1252_v51  ;;  %v611_v34 = vmul.f32 %v1192_v7, %v1286_v50  ;;  %v610_v6 = vmul.f32 %v1192_v7, %v1275_v33 }
 0x16c   :  { %v640_v10 = vpop.permute.xlu1 %639  ;;  %529 = vrot.lane.b32.xlu0 %v515_v0, %s1025_s4  ;;  %v492_v4 = vadd.f32 %v484_v48, %v468_v13  ;;  %v629_v40 = vmul.f32 %v1196_v9, %v1163_v59  ;;  %v609_v2 = vmul.f32 %v1188_v5, %v1339_v16  ;;  %v496_v58 = vadd.f32 %v488_v1, %v472_v53  ;;  %v1008_v9 = vld [vmem:[%s1623_s1 + $0x8] sm:$0xff]  }
 0x16d   :  { %v631_v14 = vadd.f32 %v623_v15, %v607_v23  ;;  %v612_v32 = vmul.f32 %v1192_v7, %v1312_v20  ;;  %v613_v19 = vmul.f32 %v1192_v7, %v1349_v43  ;;  %v646_v62 = vmul.f32 %v640_v10, %v1279_v38  ;;  %953 = vmatmul.mubr.msk.bf16.gmra.mxu0 %vm71_vm0, %v1008_v9 }
 0x16e   :  { %v516_v36 = vadd.f32 %v508_v11, %v492_v4  ;;  %v647_v5 = vmul.f32 %v640_v10, %v1292_v22  ;;  %v648_v13 = vmul.f32 %v640_v10, %v1326_v35  ;;  %v520_v54 = vadd.f32 %v512_v25, %v496_v58  ;;  %956 = vmatmul.mubr.msk.bf16.gmra.mxu1 %vm71_vm0, %v1008_v9 }
 0x16f   :  { %531 = vrot.lane.b32.xlu1 %v519_v63, %s1025_s4  ;;  %v630_v23 = vadd.f32 %v1240_v41, %v606_v55  ;;  %v634_v7 = vadd.f32 %v626_v17, %v610_v6  ;;  %v632_v53 = vadd.f32 %v1244_v42, %v608_v26  ;;  %v635_v12 = vadd.f32 %v627_v45, %v611_v34 }
 0x170   :  { %v644_v8 = vpop.permute.xlu0 %643  ;;  %533 = vrot.lane.b32.xlu0 %v516_v36, %s1025_s4  ;;  %v1419_v11 = vadd.f32 %v625_v3, %v609_v2  ;;  %v636_v4 = vadd.f32 %v628_v18, %v612_v32  ;;  %v1422_v58 = vadd.f32 %v629_v40, %v613_v19  ;;  %v1639_v41 = vmov 0  }
 0x171   :  { %v379_v60 = vpop.permute.xlu1 %378  ;;  %v650_v15 = vmul.f32 %v644_v8, %v1305_v30  ;;  %v651_v0 = vmul.f32 %v644_v8, %v1307_v61  ;;  %v652_v48 = vmul.f32 %v644_v8, %v1333_v37  ;;  %v654_v63 = vadd.f32 %v646_v62, %v630_v23  ;;  %133 = vmatprep.mubr.bf16.mxu0 %v1639_v41 }
 0x172   :  { %v649_v42 = vmul.f32 %v640_v10, %v1352_v44  ;;  %v655_v17 = vadd.f32 %v647_v5, %v631_v14  ;;  %v656_v26 = vadd.f32 %v648_v13, %v632_v53  ;;  %196 = vmatprep.mubr.bf16.mxu1 %v1639_v41  ;;  %v653_v3 = vmul.f32 %v644_v8, %v1358_v21 }
 0x173   :  { %535 = vrot.lane.b32.xlu1 %v520_v54, %s1025_s4  ;;  %v658_v45 = vadd.f32 %v650_v15, %v634_v7  ;;  %v385_v55 = vmul.f32 %v379_v60, %v1252_v51  ;;  %v386_v34 = vmul.f32 %v379_v60, %v1270_v31  ;;  %v387_v6 = vmul.f32 %v379_v60, %v1290_v29 }
 0x174   :  { %662 = vrot.lane.b32.xlu0 %v654_v63, %s1026_s13  ;;  %v388_v10 = vmul.f32 %v379_v60, %v1339_v16  ;;  %v659_v40 = vadd.f32 %v651_v0, %v635_v12  ;;  %v660_v2 = vadd.f32 %v652_v48, %v636_v4  ;;  %v657_v12 = vadd.f32 %v649_v42, %v1419_v11 }
 0x175   :  { %v383_v1 = vpop.permute.xlu1 %382  ;;  %v395_v25 = vpop.permute.xlu0 %394  ;;  %v661_v0 = vadd.f32 %v653_v3, %v1422_v58 }
 0x176   :  { %v401_v18 = vmul.f32 %v395_v25, %v1138_v39  ;;  %v389_v14 = vmul.f32 %v383_v1, %v1275_v33  ;;  %v390_v8 = vmul.f32 %v383_v1, %v1286_v50  ;;  %v391_v51 = vmul.f32 %v383_v1, %v1312_v20  ;;  %v1009_v39 = vld [vmem:[%s1623_s1 + $0x10] sm:$0xff]  }
 0x177   :  { %664 = vrot.lane.b32.xlu1 %v658_v45, %s1026_s13  ;;  %v392_v31 = vmul.f32 %v383_v1, %v1349_v43  ;;  %v402_v29 = vmul.f32 %v395_v25, %v1153_v52  ;;  %v403_v16 = vmul.f32 %v395_v25, %v1141_v46  ;;  %v404_v32 = vmul.f32 %v395_v25, %v1157_v56  ;;  %v1640_v45 = vld [vmem:[#allocation2_spill] sm:$0xff] }
 0x178   :  { %v409_v19 = vadd.f32 %v401_v18, %v385_v55  ;;  %666 = vrot.lane.b32.xlu0 %v655_v17, %s1026_s13  ;;  %954 = vmatmul.mubr.msk.bf16.gmra.mxu0 %vm71_vm0, %v1009_v39  ;;  %v689_v55 = vsub.s32 3, %v1640_v45  ;;  %v1641_v18 = vld [vmem:[#allocation3_spill] sm:$0xff] }
 0x179   :  { %v412_v15 = vadd.f32 %v404_v32, %v388_v10  ;;  %957 = vmatmul.mubr.msk.bf16.gmra.mxu1 %vm71_vm0, %v1009_v39  ;;  %814 = vmatprep.mubr.bf16.mxu0 %v1639_v41 }
 0x17a   :  { %v399_v62 = vpop.permute.xlu1 %398  ;;  %v423_v36 = vpop.permute.xlu0 %422  ;;  %867 = vmatprep.mubr.bf16.mxu1 %v1639_v41 }
 0x17b   :  { %v405_v33 = vmul.f32 %v399_v62, %v1143_v47  ;;  %v406_v50 = vmul.f32 %v399_v62, %v1159_v57  ;;  %v407_v20 = vmul.f32 %v399_v62, %v1147_v49  ;;  %v408_v43 = vmul.f32 %v399_v62, %v1163_v59  ;;  %668 = vrot.lane.b32.xlu1 %v659_v40, %s1026_s13 }
 0x17c   :  { %v429_v60 = vmul.f32 %v423_v36, %v1305_v30  ;;  %v430_v52 = vmul.f32 %v423_v36, %v1307_v61  ;;  %v431_v46 = vmul.f32 %v423_v36, %v1333_v37  ;;  %v432_v56 = vmul.f32 %v423_v36, %v1358_v21  ;;  %670 = vrot.lane.b32.xlu0 %v656_v26, %s1026_s13 }
 0x17d   :  { %v413_v9 = vadd.f32 %v405_v33, %v389_v14  ;;  %v414_v5 = vadd.f32 %v406_v50, %v390_v8  ;;  %v415_v13 = vadd.f32 %v407_v20, %v391_v51  ;;  %v416_v47 = vadd.f32 %v408_v43, %v392_v31 }
 0x17e   :  { %v410_v57 = vadd.f32 %v402_v29, %v386_v34  ;;  %v411_v49 = vadd.f32 %v403_v16, %v387_v6  ;;  %v552_v26 = vsub.s32 6, %v1640_v45  ;;  %v693_v34 = vsub.s32 7, %v1640_v45 }
 0x17f   :  { %v419_v59 = vpop.permute.xlu1 %418  ;;  %v1460_v30 = vadd.f32 %v429_v60, %v413_v9  ;;  %v1462_v61 = vadd.f32 %v430_v52, %v414_v5  ;;  %v1464_v37 = vadd.f32 %v431_v46, %v415_v13  ;;  %v1466_v21 = vadd.f32 %v432_v56, %v416_v47  ;;  %672 = vrot.lane.b32.xlu1 %v660_v2, %s1026_s13  ;;  %v1642_v2 = vld [vmem:[#allocation4_spill] sm:$0xff] }
 0x180   :  { %v425_v54 = vmul.f32 %v419_v59, %v1279_v38  ;;  %v426_v23 = vmul.f32 %v419_v59, %v1292_v22  ;;  %v427_v7 = vmul.f32 %v419_v59, %v1326_v35  ;;  %v428_v53 = vmul.f32 %v419_v59, %v1352_v44  ;;  %674 = vrot.lane.b32.xlu0 %v657_v12, %s1026_s13  ;;  %v41_v22 = vld [vmem:[%s1624_s3 + $0x18] sm:$0xff]  ;;  %v40_v35 = vld [vmem:[%s1624_s3 + $0x10] sm:$0xff] }
 0x181   :  { %v1027_v38 = vmov 11   ;;  %v553_v40 = vrot.slane %v1641_v18, %v552_v26  ;;  %v561_v8 = vrot.slane %v1642_v2, %v552_v26  ;;  %v690_v31 = vrot.slane %v1641_v18, %v689_v55 }
 0x182   :  { %v433_v48 = vadd.f32 %v425_v54, %v409_v19  ;;  %v434_v63 = vadd.f32 %v426_v23, %v410_v57  ;;  %v435_v1 = vadd.f32 %v427_v7, %v411_v49  ;;  %v436_v25 = vadd.f32 %v428_v53, %v412_v15  ;;  %1006 = vset.pattern.permute.xlu1 %v1027_v38 }
 0x183   :  { %676 = vrot.lane.b32.xlu1 %v661_v0, %s1026_s13  ;;  %1005 = vset.pattern.permute.xlu0 %v1027_v38  ;;  %v694_v39 = vrot.slane %v1641_v18, %v693_v34  ;;  %v698_v29 = vrot.slane %v1642_v2, %v689_v55  ;;  %v702_v16 = vrot.slane %v1642_v2, %v693_v34 }
 0x184   :  { %748 = vperm.xlu0 %1005, %v1115_v27   ;;  %v443_v44 = vpop.permute.xlu1 %442  ;;  %v710_v60 = vrot.slane %v690_v31, %v689_v55 }
 0x185   :  { %v714_v52 = vrot.slane %v694_v39, %v689_v55  ;;  %v718_v46 = vrot.slane %v698_v29, %v689_v55  ;;  %v722_v56 = vrot.slane %v702_v16, %v689_v55  ;;  %v449_v9 = vadd.f32 %v443_v44, %v433_v48 }
 0x186   :  { %v450_v57 = vadd.f32 %v443_v44, %v434_v63  ;;  %v451_v49 = vadd.f32 %v443_v44, %v435_v1  ;;  %v452_v48 = vadd.f32 %v443_v44, %v436_v25 }
 0x187   :  { %752 = vperm.xlu1 %1006, %v1122_v28   ;;  %v548_v28 = vsub.s32 2, %v1640_v45 }
 0x188   :  { %762 = vperm.xlu0 %1005, %v41_v22   ;;  %v1486_v11 = vpop.permute.xlu1 %446 }
 0x189   :  { %v549_v6 = vrot.slane %v1641_v18, %v548_v28  ;;  %v557_v14 = vrot.slane %v1642_v2, %v548_v28  ;;  %v573_v33 = vrot.slane %v553_v40, %v548_v28  ;;  %v581_v20 = vrot.slane %v561_v8, %v548_v28 }
 0x18a   :  { %v453_v15 = vadd.f32 %v1486_v11, %v1460_v30  ;;  %v455_v34 = vadd.f32 %v1486_v11, %v1464_v37 }
 0x18b   :  { %757 = vperm.xlu1 %1006, %v40_v35   ;;  %v569_v32 = vrot.slane %v549_v6, %v548_v28  ;;  %v577_v50 = vrot.slane %v557_v14, %v548_v28  ;;  %v454_v28 = vadd.f32 %v1486_v11, %v1462_v61  ;;  %v456_v61 = vadd.f32 %v1486_v11, %v1466_v21 }
 0x1d6   :  { %v522_v4 = vpop.permute.xlu0 %521 }
 0x1d9   :  { %v524_v58 = vpop.permute.xlu1 %523 }
 0x1da   :  { %v526_v42 = vpop.permute.xlu0 %525 }
 0x1db   :  { %v542_v5 = vsel %vm537_vm3, %v522_v4, %v526_v42 }
 0x1dc   :  { %v583_v63 = vmul.f32 %v573_v33, %v542_v5 }
 0x1dd   :  { %v528_v17 = vpop.permute.xlu1 %527 }
 0x1de   :  { %v530_v27 = vpop.permute.xlu0 %529  ;;  %v543_v59 = vsel %vm537_vm3, %v524_v58, %v528_v17  ;;  %v591_v18 = vadd.f32 %v583_v63, %v450_v57 }
 0x1df   :  { %v540_v23 = vsel %vm537_vm3, %v526_v42, %v530_v27  ;;  %v587_v38 = vmul.f32 %v573_v33, %v543_v59 }
 0x1e1   :  { %v532_v3 = vpop.permute.xlu1 %531  ;;  %v595_v40 = vadd.f32 %v587_v38, %v454_v28 }
 0x1e2   :  { %v534_v10 = vpop.permute.xlu0 %533  ;;  %v541_v53 = vsel %vm537_vm3, %v528_v17, %v532_v3 }
 0x1e3   :  { %v544_v19 = vsel %vm537_vm3, %v534_v10, %v522_v4  ;;  %v538_v7 = vsel %vm537_vm3, %v530_v27, %v534_v10  ;;  %v588_v27 = vmul.f32 %v577_v50, %v541_v53 }
 0x1e4   :  { %v582_v13 = vmul.f32 %v569_v32, %v544_v19  ;;  %v585_v42 = vmul.f32 %v581_v20, %v538_v7 }
 0x1e5   :  { %v536_v51 = vpop.permute.xlu1 %535  ;;  %v596_v31 = vadd.f32 %v588_v27, %v455_v34 }
 0x1e6   :  { %v663_v62 = vpop.permute.xlu0 %662  ;;  %v545_v36 = vsel %vm537_vm3, %v536_v51, %v524_v58  ;;  %v590_v22 = vadd.f32 %v582_v13, %v449_v9  ;;  %v584_v58 = vmul.f32 %v577_v50, %v540_v23  ;;  %v539_v17 = vsel %vm537_vm3, %v532_v3, %v536_v51 }
 0x1e7   :  { %v586_v47 = vmul.f32 %v569_v32, %v545_v36  ;;  %v589_v3 = vmul.f32 %v581_v20, %v539_v17  ;;  %v593_v51 = vadd.f32 %v585_v42, %v452_v48 }
 0x1e8   :  { %v592_v8 = vadd.f32 %v584_v58, %v451_v49 }
 0x1e9   :  { %v665_v43 = vpop.permute.xlu1 %664  ;;  %v594_v35 = vadd.f32 %v586_v47, %v453_v15  ;;  %v597_v11 = vadd.f32 %v589_v3, %v456_v61 }
 0x1ea   :  { %v667_v54 = vpop.permute.xlu0 %666 }
 0x1eb   :  { %v683_v12 = vsel %vm678_vm4, %v663_v62, %v667_v54 }
 0x1ec   :  { %v723_v30 = vmul.f32 %v710_v60, %v683_v12 }
 0x1ed   :  { %v669_v0 = vpop.permute.xlu1 %668 }
 0x1ee   :  { %v684_v1 = vsel %vm678_vm4, %v665_v43, %v669_v0  ;;  %v671_v45 = vpop.permute.xlu0 %670  ;;  %v731_v25 = vadd.f32 %v723_v30, %v590_v22 }
 0x1ef   :  { %v727_v4 = vmul.f32 %v710_v60, %v684_v1  ;;  %v681_v44 = vsel %vm678_vm4, %v667_v54, %v671_v45 }
 0x1f0   :  { %v724_v6 = vmul.f32 %v714_v52, %v681_v44 }
 0x1f1   :  { %v735_v26 = vadd.f32 %v727_v4, %v594_v35  ;;  %v673_v55 = vpop.permute.xlu1 %672 }
 0x1f2   :  { %v682_v10 = vsel %vm678_vm4, %v669_v0, %v673_v55  ;;  %v675_v39 = vpop.permute.xlu0 %674  ;;  %v732_v29 = vadd.f32 %v724_v6, %v591_v18 }
 0x1f3   :  { %v743_v2 = vpack.c.bf16 %v735_v26, %v731_v25  ;;  %v728_v14 = vmul.f32 %v714_v52, %v682_v10  ;;  %v679_v37 = vsel %vm678_vm4, %v671_v45, %v675_v39  ;;  %v685_v16 = vsel %vm678_vm4, %v675_v39, %v663_v62  ;;  %v1010_v62 = vld [vmem:[%s1626_s2] sm:$0xff]  }
 0x1f4   :  { %v725_v36 = vmul.f32 %v718_v46, %v679_v37  ;;  %v726_v33 = vmul.f32 %v722_v56, %v685_v16 }
 0x1f5   :  { %v736_v32 = vadd.f32 %v728_v14, %v595_v40  ;;  %v677_v19 = vpop.permute.xlu1 %676 }
 0x1f6   :  { %v680_v50 = vsel %vm678_vm4, %v673_v55, %v677_v19  ;;  %v686_v21 = vsel %vm678_vm4, %v677_v19, %v665_v43  ;;  %v733_v9 = vadd.f32 %v725_v36, %v592_v8  ;;  %v734_v5 = vadd.f32 %v726_v33, %v593_v51 }
 0x1f7   :  { %v729_v20 = vmul.f32 %v718_v46, %v680_v50  ;;  %v730_v60 = vmul.f32 %v722_v56, %v686_v21  ;;  %v744_v52 = vpack.c.bf16 %v736_v32, %v732_v29 }
 0x1f9   :  { %v737_v13 = vadd.f32 %v729_v20, %v596_v31  ;;  %v738_v47 = vadd.f32 %v730_v60, %v597_v11  ;;  %796 = vmatprep.subr.bf16.mxu0 %v744_v52 }
 0x1fa   :  { %797 = vmatpush1.bf16.msra.mxu0 %v743_v2 }
 0x1fb   :  { %v745_v57 = vpack.c.bf16 %v737_v13, %v733_v9  ;;  %v746_v49 = vpack.c.bf16 %v738_v47, %v734_v5 }
 0x1fd   :  { %960 = vmatmul.mubr.msk.bf16.vlgmr.msra.gmra.mxu0 %vm775_vm5, %v1010_v62  ;;  %849 = vmatprep.subr.bf16.mxu1 %v746_v49 }
 0x1fe   :  { %850 = vmatpush1.bf16.msra.mxu1 %v745_v57  ;;  %824 = vmatprep.mubr.bf16.mxu0 %v1639_v41 }
 0x1ff   :  { %v749_v1 = vpop.permute.xlu0 %748 }
 0x201   :  { %962 = vmatmul.mubr.msk.bf16.vlgmr.msra.gmra.mxu1 %vm775_vm5, %v1010_v62 }
 0x202   :  { %877 = vmatprep.mubr.bf16.mxu1 %v1639_v41  ;;  %v753_v35 = vpop.permute.xlu1 %752 }
 0x203   :  { %v763_v29 = vpop.permute.xlu0 %762 }
 0x205   :  { %961 = vmatmul.mubr.msk.bf16.gmra.mxu0 %vm775_vm5, %v1011_v24 }
 0x206   :  { %v758_v3 = vpop.permute.xlu1 %757 }
 0x209   :  { %963 = vmatmul.mubr.msk.bf16.gmra.mxu1 %vm775_vm5, %v1011_v24 }
 0x22d   :  { %v125_v43 = vpop.f32.mrf.mxu0 }
 0x22e   :  { %v188_v46 = vpop.f32.mrf.mxu1 }
 0x22f   :  { %v127_v56 = vpop.f32.mrf.mxu0 }
 0x230   :  { %v190_v15 = vpop.f32.mrf.mxu1 }
 0x231   :  { %v129_v59 = vpop.f32.mrf.mxu0 }
 0x232   :  { %v192_v54 = vpop.f32.mrf.mxu1 }
 0x233   :  { %v131_v23 = vpop.f32.mrf.mxu0 }
 0x234   :  { %v1550_v7 = vpop.f32.mrf.mxu1 }
 0x238   :  { %v135_v53 = vpop.f32.mrf.mxu0 }
 0x239   :  { %v1552_v12 = vpop.f32.mrf.mxu1 }
 0x23a   :  { %v1554_v0 = vpop.f32.mrf.mxu0 }
 0x23b   :  { %v1556_v48 = vpop.f32.mrf.mxu1 }
 0x23c   :  { %v1558_v63 = vpop.f32.mrf.mxu0 }
 0x23d   :  { %v1560_v41 = vpop.f32.mrf.mxu1 }
 0x23e   :  { %v1562_v30 = vpop.f32.mrf.mxu0 }
 0x23f   :  { %v1564_v4 = vpop.f32.mrf.mxu1 }
 0x2bd   :  { %v816_v38 = vpop.f32.mrf.mxu0 }
 0x2be   :  { %v817_v22 = vadd.f32 %v816_v38, %v749_v1 }
 0x2bf   :  { %v818_v58 = vpop.f32.mrf.mxu0 }
 0x2c0   :  { %v819_v42 = vadd.f32 %v818_v58, %v749_v1  ;;  %v888_v27 = vmax.f32 %v817_v22, 0.0 }
 0x2c1   :  { %v820_v17 = vpop.f32.mrf.mxu0  ;;  %v869_v45 = vpop.f32.mrf.mxu1 }
 0x2c2   :  { %v870_v28 = vadd.f32 %v869_v45, %v749_v1  ;;  %v889_v25 = vmax.f32 %v819_v42, 0.0  ;;  %v904_v44 = vadd.f32 %v888_v27, %v125_v43  ;;  %v821_v26 = vadd.f32 %v820_v17, %v753_v35 }
 0x2c3   :  { %v822_v55 = vpop.f32.mrf.mxu0  ;;  %v871_v34 = vpop.f32.mrf.mxu1 }
 0x2c4   :  { %v890_v18 = vmax.f32 %v870_v28, 0.0  ;;  %v905_v6 = vadd.f32 %v889_v25, %v127_v56  ;;  %920 = vst [vmem:[%s1627_s5] sm:$0xff] %v904_v44  ;;  %v892_v10 = vmax.f32 %v821_v26, 0.0  ;;  %v823_v40 = vadd.f32 %v822_v55, %v753_v35 }
 0x2c5   :  { %v872_v2 = vadd.f32 %v871_v34, %v749_v1  ;;  %v826_v14 = vpop.f32.mrf.mxu0  ;;  %v873_v61 = vpop.f32.mrf.mxu1 }
 0x2c6   :  { %v906_v8 = vadd.f32 %v890_v18, %v188_v46  ;;  %921 = vst [vmem:[%s1627_s5 + $0x8] sm:$0xff] %v905_v6  ;;  %v908_v51 = vadd.f32 %v892_v10, %v129_v59  ;;  %v893_v31 = vmax.f32 %v823_v40, 0.0  ;;  %v874_v39 = vadd.f32 %v873_v61, %v753_v35 }
 0x2c7   :  { %v891_v37 = vmax.f32 %v872_v2, 0.0  ;;  %v828_v16 = vpop.f32.mrf.mxu0  ;;  %v875_v32 = vpop.f32.mrf.mxu1  ;;  %v827_v19 = vadd.f32 %v826_v14, %v758_v3 }
 0x2c8   :  { %964 = vst [vmem:[%s1627_s5 + $0x40] sm:$0xff] %v906_v8  ;;  %922 = vst [vmem:[%s1627_s5 + $0x10] sm:$0xff] %v908_v51  ;;  %v909_v36 = vadd.f32 %v893_v31, %v131_v23  ;;  %v894_v33 = vmax.f32 %v874_v39, 0.0  ;;  %v876_v50 = vadd.f32 %v875_v32, %v753_v35  ;;  %v829_v21 = vadd.f32 %v828_v16, %v758_v3 }
 0x2c9   :  { %v907_v11 = vadd.f32 %v891_v37, %v190_v15  ;;  %v830_v20 = vpop.f32.mrf.mxu0  ;;  %v879_v60 = vpop.f32.mrf.mxu1  ;;  %v896_v52 = vmax.f32 %v827_v19, 0.0 }
 0x2ca   :  { %923 = vst [vmem:[%s1627_s5 + $0x18] sm:$0xff] %v909_v36  ;;  %v910_v9 = vadd.f32 %v894_v33, %v192_v54  ;;  %v895_v5 = vmax.f32 %v876_v50, 0.0  ;;  %v831_v13 = vadd.f32 %v830_v20, %v763_v29  ;;  %v880_v47 = vadd.f32 %v879_v60, %v758_v3 }
 0x2cb   :  { %965 = vst [vmem:[%s1627_s5 + $0x48] sm:$0xff] %v907_v11  ;;  %v897_v62 = vmax.f32 %v829_v21, 0.0  ;;  %v912_v57 = vadd.f32 %v896_v52, %v135_v53  ;;  %v832_v49 = vpop.f32.mrf.mxu0  ;;  %v881_v24 = vpop.f32.mrf.mxu1 }
 0x2cc   :  { %966 = vst [vmem:[%s1627_s5 + $0x50] sm:$0xff] %v910_v9  ;;  %v911_v43 = vadd.f32 %v895_v5, %v1550_v7  ;;  %v900_v46 = vmax.f32 %v831_v13, 0.0  ;;  %v898_v56 = vmax.f32 %v880_v47, 0.0  ;;  %v833_v15 = vadd.f32 %v832_v49, %v763_v29 }
 0x2cd   :  { %v913_v59 = vadd.f32 %v897_v62, %v1554_v0  ;;  %924 = vst [vmem:[%s1627_s5 + $0x20] sm:$0xff] %v912_v57  ;;  %v882_v54 = vadd.f32 %v881_v24, %v758_v3  ;;  %v883_v23 = vpop.f32.mrf.mxu1 }
 0x2ce   :  { %967 = vst [vmem:[%s1627_s5 + $0x58] sm:$0xff] %v911_v43  ;;  %v916_v53 = vadd.f32 %v900_v46, %v1558_v63  ;;  %v914_v1 = vadd.f32 %v898_v56, %v1552_v12  ;;  %v901_v7 = vmax.f32 %v833_v15, 0.0  ;;  %v884_v38 = vadd.f32 %v883_v23, %v763_v29 }
 0x2cf   :  { %925 = vst [vmem:[%s1627_s5 + $0x28] sm:$0xff] %v913_v59  ;;  %v899_v0 = vmax.f32 %v882_v54, 0.0  ;;  %v885_v22 = vpop.f32.mrf.mxu1 }
 0x2d0   :  { %926 = vst [vmem:[%s1627_s5 + $0x30] sm:$0xff] %v916_v53  ;;  %968 = vst [vmem:[%s1627_s5 + $0x60] sm:$0xff] %v914_v1  ;;  %v917_v63 = vadd.f32 %v901_v7, %v1562_v30  ;;  %v902_v35 = vmax.f32 %v884_v38, 0.0  ;;  %v886_v12 = vadd.f32 %v885_v22, %v763_v29 }
 0x2d1   :  { %v915_v58 = vadd.f32 %v899_v0, %v1556_v48 }
 0x2d2   :  { %927 = vst [vmem:[%s1627_s5 + $0x38] sm:$0xff] %v917_v63  ;;  %v918_v42 = vadd.f32 %v902_v35, %v1560_v41  ;;  %v903_v27 = vmax.f32 %v886_v12, 0.0 }
 0x2d3   :  { %969 = vst [vmem:[%s1627_s5 + $0x68] sm:$0xff] %v915_v58 }
 0x2d4   :  { %970 = vst [vmem:[%s1627_s5 + $0x70] sm:$0xff] %v918_v42  ;;  %v919_v30 = vadd.f32 %v903_v27, %v1564_v4 }
 0x2d6   :  { %971 = vst [vmem:[%s1627_s5 + $0x78] sm:$0xff] %v919_v30 }

</bundles_post_ra>
